<compile_context>
chip_gen: v5e
topology: v5e:2x2
jax: 0.10.0
libtpu: 0.0.40
codegen_flags: <defaults>
</compile_context>

<pallas_src>
import jax
import jax.numpy as jnp
from jax.experimental import pallas as pl
from jax.experimental.pallas import tpu as pltpu


def _mlp_kernel(x_ref, w1_ref, b1_ref, w2_ref, b2_ref, o_ref):
    # x:  (TB, D) bf16    w1: (D, H) bf16    b1: (1, H)  f32
    # w2: (H, Cp) f32     b2: (1, Cp) f32    o:  (TB, Cp) f32
    h = jnp.dot(x_ref[...], w1_ref[...], preferred_element_type=jnp.float32)
    h = jnp.maximum(h + b1_ref[...], 0.0)                 # bias + ReLU in f32
    out = jnp.dot(h, w2_ref[...], preferred_element_type=jnp.float32)
    o_ref[...] = (out + b2_ref[...]).astype(o_ref.dtype)  # lane-dense full store


def time_order_classifier(x, w1, b1, w2, b2, *, tb=512):
    """Forward pass: fc2(relu(fc1(x))).

    x : (B, D) float32
    w1: (D, 32) float32   b1: (32,) float32     (weights stored as (in, out))
    w2: (32, 2) float32   b2: (2,)  float32
    returns (B, 2) float32
    """
    B, D = x.shape
    H = w1.shape[1]
    C = w2.shape[1]

    LANES = 128
    # Lane-dense output width (pad fc2 columns with zeros -> extra logits are 0,
    # sliced away in the wrapper).
    Cp = max(LANES, ((C + LANES - 1) // LANES) * LANES)

    # Batch tile: multiple of 8 sublanes, big enough to amortize per-step
    # overhead at large B, small enough to fit v7x's 32 MiB scoped VMEM even
    # with the 128-lane padding of the narrow feature dims.
    TB = min(tb, ((B + 7) // 8) * 8)
    B_pad = ((B + TB - 1) // TB) * TB

    x_p = x if B_pad == B else jnp.pad(x, ((0, B_pad - B), (0, 0)))

    # bf16 for the HBM-dominant operands (x at large B) and the fc1 weight;
    # MXU is bf16-native on v5e/v6e/v7x, accumulation stays f32.
    x_bf = x_p.astype(jnp.bfloat16)
    w1_bf = w1.astype(jnp.bfloat16)

    # Zero-pad fc2 weight/bias to the lane-dense width; keep them (and b1) f32.
    w2_p = jnp.pad(w2.astype(jnp.float32), ((0, 0), (0, Cp - C)))
    b2_p = jnp.pad(b2.astype(jnp.float32), (0, Cp - C)).reshape(1, Cp)
    b1_2d = b1.astype(jnp.float32).reshape(1, H)

    out_padded = pl.pallas_call(
        _mlp_kernel,
        out_shape=jax.ShapeDtypeStruct((B_pad, Cp), jnp.float32),
        grid=(B_pad // TB,),
        in_specs=[
            pl.BlockSpec((TB, D), lambda i: (i, 0)),   # batch-tiled activations
            pl.BlockSpec((D, H), lambda i: (0, 0)),    # resident fc1 weight
            pl.BlockSpec((1, H), lambda i: (0, 0)),    # resident fc1 bias
            pl.BlockSpec((H, Cp), lambda i: (0, 0)),   # resident fc2 weight (padded)
            pl.BlockSpec((1, Cp), lambda i: (0, 0)),   # resident fc2 bias (padded)
        ],
        out_specs=pl.BlockSpec((TB, Cp), lambda i: (i, 0)),
        compiler_params=pltpu.CompilerParams(
            dimension_semantics=("parallel",)),
    )(x_bf, w1_bf, b1_2d, w2_p, b2_p)

    return out_padded[:B, :C]


def _reference_f32(x, w1, b1, w2, b2):
    h = jnp.maximum(x @ w1 + b1, 0.0)
    return h @ w2 + b2


def _reference_bf16(x, w1, b1, w2, b2):
    # Same bf16 casts the kernel applies, so the comparison isolates the
    # Pallas lowering rather than the (intentional) bf16 quantization.
    xb = x.astype(jnp.bfloat16).astype(jnp.float32)
    w1b = w1.astype(jnp.bfloat16).astype(jnp.float32)
    h = jnp.maximum(xb @ w1b + b1, 0.0)
    return h @ w2 + b2


if __name__ == "__main__":
    # Small shapes consistent with the module: input_size=16, batch=8.
    B, D, H, C = 8, 16, 32, 2

    key = jax.random.PRNGKey(0)
    kx, k1, k2, k3, k4 = jax.random.split(key, 5)

    x = jax.random.normal(kx, (B, D), dtype=jnp.float32)

    # Deterministic parameter init (uniform, roughly PyTorch's fan-in scale).
    lim1 = 1.0 / (D ** 0.5)
    lim2 = 1.0 / (H ** 0.5)
    w1 = jax.random.uniform(k1, (D, H), minval=-lim1, maxval=lim1, dtype=jnp.float32)
    b1 = jax.random.uniform(k2, (H,), minval=-lim1, maxval=lim1, dtype=jnp.float32)
    w2 = jax.random.uniform(k3, (H, C), minval=-lim2, maxval=lim2, dtype=jnp.float32)
    b2 = jax.random.uniform(k4, (C,), minval=-lim2, maxval=lim2, dtype=jnp.float32)

    out = time_order_classifier(x, w1, b1, w2, b2)
    out = jax.block_until_ready(out)

    assert out.shape == (B, C)

    ref_bf16 = _reference_bf16(x, w1, b1, w2, b2)
    assert jnp.allclose(out, ref_bf16, atol=1e-4, rtol=1e-4), "mismatch vs bf16-consistent reference"

    ref_f32 = _reference_f32(x, w1, b1, w2, b2)
    assert jnp.allclose(out, ref_f32, atol=3e-2, rtol=3e-2), "mismatch vs f32 reference"

    print("KERNEL_OK")
</pallas_src>

<mosaic_0001>
module attributes {stable_mosaic.version = 11 : i64} {
  func.func @_mlp_kernel(%arg0: i32, %arg1: memref<8x16xbf16, #tpu.memory_space<vmem>>, %arg2: memref<16x32xbf16, #tpu.memory_space<vmem>>, %arg3: memref<1x32xf32, #tpu.memory_space<vmem>>, %arg4: memref<32x128xf32, #tpu.memory_space<vmem>>, %arg5: memref<1x128xf32, #tpu.memory_space<vmem>>, %arg6: memref<8x128xf32, #tpu.memory_space<vmem>>) attributes {dimension_semantics = [#tpu.dimension_semantics<parallel>], iteration_bounds = array<i64: 1>, scalar_prefetch = 0 : i64, scratch_operands = 0 : i64, tpu.core_type = #tpu.core_type<tc>, window_params = [{transform_indices = @transform_0, window_bounds = array<i64: 8, 16>}, {pipeline_mode = #tpu.pipeline_mode<synchronous>, transform_indices = @transform_1, window_bounds = array<i64: 16, 32>}, {pipeline_mode = #tpu.pipeline_mode<synchronous>, transform_indices = @transform_2, window_bounds = array<i64: 1, 32>}, {pipeline_mode = #tpu.pipeline_mode<synchronous>, transform_indices = @transform_3, window_bounds = array<i64: 32, 128>}, {pipeline_mode = #tpu.pipeline_mode<synchronous>, transform_indices = @transform_4, window_bounds = array<i64: 1, 128>}, {transform_indices = @transform_5, window_bounds = array<i64: 8, 128>}]} {
    %c0 = arith.constant 0 : index
    %c0_0 = arith.constant 0 : index
    %0 = vector.load %arg1[%c0, %c0_0] : memref<8x16xbf16, #tpu.memory_space<vmem>>, vector<8x16xbf16>
    %c0_1 = arith.constant 0 : index
    %c0_2 = arith.constant 0 : index
    %1 = vector.load %arg2[%c0_1, %c0_2] : memref<16x32xbf16, #tpu.memory_space<vmem>>, vector<16x32xbf16>
    %cst = arith.constant dense<0.000000e+00> : vector<8x32xf32>
    %2 = tpu.matmul %0, %1, %cst {dimension_numbers = #tpu.dot_dimension_numbers<[1], [0], [0], [1], [0, 0, 1, 1], [], []>} : vector<8x16xbf16>, vector<16x32xbf16>, vector<8x32xf32> -> vector<8x32xf32>
    %c0_3 = arith.constant 0 : index
    %c0_4 = arith.constant 0 : index
    %3 = vector.load %arg3[%c0_3, %c0_4] : memref<1x32xf32, #tpu.memory_space<vmem>>, vector<1x32xf32>
    %4 = vector.broadcast %3 : vector<1x32xf32> to vector<8x32xf32>
    %5 = arith.addf %2, %4 : vector<8x32xf32>
    %cst_5 = arith.constant 0.000000e+00 : f32
    %6 = vector.broadcast %cst_5 : f32 to vector<8x32xf32>
    %7 = arith.maximumf %5, %6 : vector<8x32xf32>
    %c0_6 = arith.constant 0 : index
    %c0_7 = arith.constant 0 : index
    %8 = vector.load %arg4[%c0_6, %c0_7] : memref<32x128xf32, #tpu.memory_space<vmem>>, vector<32x128xf32>
    %cst_8 = arith.constant dense<0.000000e+00> : vector<8x128xf32>
    %9 = tpu.matmul %7, %8, %cst_8 {dimension_numbers = #tpu.dot_dimension_numbers<[1], [0], [0], [1], [0, 0, 1, 1], [], []>} : vector<8x32xf32>, vector<32x128xf32>, vector<8x128xf32> -> vector<8x128xf32>
    %c0_9 = arith.constant 0 : index
    %c0_10 = arith.constant 0 : index
    %10 = vector.load %arg5[%c0_9, %c0_10] : memref<1x128xf32, #tpu.memory_space<vmem>>, vector<1x128xf32>
    %11 = vector.broadcast %10 : vector<1x128xf32> to vector<8x128xf32>
    %12 = arith.addf %9, %11 : vector<8x128xf32>
    %c0_11 = arith.constant 0 : index
    %c0_12 = arith.constant 0 : index
    %13 = vector.load %arg6[%c0_11, %c0_12] : memref<8x128xf32, #tpu.memory_space<vmem>>, vector<8x128xf32>
    tpu.vector_store %arg6[%c0_11, %c0_12], %12 {strides = array<i32>} : memref<8x128xf32, #tpu.memory_space<vmem>>, vector<8x128xf32>,
    return
  }
  func.func @transform_0(%arg0: i32) -> (i32, i32) {
    %c0_i32 = arith.constant 0 : i32
    %c0_i32_0 = arith.constant 0 : i32
    return %arg0, %c0_i32 : i32, i32
  }
  func.func @transform_1(%arg0: i32) -> (i32, i32) {
    %c0_i32 = arith.constant 0 : i32
    %c0_i32_0 = arith.constant 0 : i32
    %c0_i32_1 = arith.constant 0 : i32
    return %c0_i32, %c0_i32_0 : i32, i32
  }
  func.func @transform_2(%arg0: i32) -> (i32, i32) {
    %c0_i32 = arith.constant 0 : i32
    %c0_i32_0 = arith.constant 0 : i32
    %c0_i32_1 = arith.constant 0 : i32
    return %c0_i32, %c0_i32_0 : i32, i32
  }
  func.func @transform_3(%arg0: i32) -> (i32, i32) {
    %c0_i32 = arith.constant 0 : i32
    %c0_i32_0 = arith.constant 0 : i32
    %c0_i32_1 = arith.constant 0 : i32
    return %c0_i32, %c0_i32_0 : i32, i32
  }
  func.func @transform_4(%arg0: i32) -> (i32, i32) {
    %c0_i32 = arith.constant 0 : i32
    %c0_i32_0 = arith.constant 0 : i32
    %c0_i32_1 = arith.constant 0 : i32
    return %c0_i32, %c0_i32_0 : i32, i32
  }
  func.func @transform_5(%arg0: i32) -> (i32, i32) {
    %c0_i32 = arith.constant 0 : i32
    %c0_i32_0 = arith.constant 0 : i32
    return %arg0, %c0_i32 : i32, i32
  }
}

</mosaic_0001>

<bundles_post_ra>
// kernel: tpu_custom_call.1
= control target key start
LH: loop header
LB: loop body
LE: loop exit
PB: predicated region body
PF: predicated region fallthrough
CT: control target
= control target key end

     0   :  { %10 = vsyncpa [#allocation3], 0  ;;  %s324_s0 = inlined_call_operand.hbm [shape: bf16[8,16], index: 0, kind: input, shape index: {}]   ;;  %s325_s1 = inlined_call_operand.hbm [shape: bf16[16,32], index: 1, kind: input, shape index: {}]   ;;  %s326_s2 = inlined_call_operand.vmem [shape: f32[1,32], index: 2, kind: input, shape index: {}]   ;;  %s327_s3 = inlined_call_operand.hbm [shape: f32[32,128], index: 3, kind: input, shape index: {}]   ;;  %s328_s4 = inlined_call_operand.vmem [shape: f32[1,128], index: 4, kind: input, shape index: {}]   ;;  %s329_s5 = inlined_call_operand.hbm [shape: f32[8,128], index: 5, kind: output, shape index: {}]  }
   0x1   :  { %11 = vsyncpa [#allocation6], 0  ;;  %s28_s20 = sshll.u32 %s325_s1, 4  ;;  %s29_s20 = int_to_ptr.hbm [resolvable:$true] %s28_s20 }
   0x2   :  { %12 = vsyncpa [#allocation4], 0  ;;  %s268_s21 = smov [#allocation5]   ;;  %s18_s25 = sshll.u32 %s324_s0, 4  ;;  %s19_s25 = int_to_ptr.hbm [resolvable:$true] %s18_s25 }
   0x3   :  { %s30_s22 = sshll.u32 %s268_s21, 4  ;;  %s269_s26 = smov 64   ;;  %s31_s22 = int_to_ptr.vmem [resolvable:$true] %s30_s22 }
   0x4   :  { %s270_s27 = smov 4   ;;  %s271_s28 = smov [#allocation2]  }
   0x5   :  { %36 = dma.hbm_to_vmem [thread:$0]  %s29_s20, 128, %s31_s22, [#allocation6], %s269_s26, %s269_s26, %s270_s27  }
   0x6   :  { %s20_s29 = sshll.u32 %s271_s28, 4  ;;  %s43_s7 = sshll.u32 %s327_s3, 4  ;;  %s21_s29 = int_to_ptr.vmem [resolvable:$true] %s20_s29  ;;  %s44_s7 = int_to_ptr.hbm [resolvable:$true] %s43_s7 }
   0x7   :  { %23 = dma.hbm_to_vmem [thread:$0]  %s19_s25, 64, %s21_s29, [#allocation3]  }
   0x8   :  { %s272_s1 = smov [#allocation7]   ;;  %s273_s9 = smov 128  }
   0x9   :  { %s45_s8 = sshll.u32 %s272_s1, 4  ;;  %s274_s10 = smov 8   ;;  %s46_s8 = int_to_ptr.vmem [resolvable:$true] %s45_s8 }
   0xa   :  { %51 = dma.hbm_to_vmem [thread:$0]  %s44_s7, 512, %s46_s8, [#allocation6], %s273_s9, %s273_s9, %s274_s10  }
   0xb   :  { %262 = dma.done.wait [#allocation3], 64  }
   0xc   :  { %263 = vsyncadd [#allocation3], 4294967232 }
   0xd   :  { %264 = dma.done.wait [#allocation6], 640  }
   0xe   :  { %265 = vsyncadd [#allocation6], 4294966656  ;;  %v155_v0 = vld [vmem:[#allocation5] sm:$0xff]  ;;  %v67_v2 = vld [vmem:[#allocation2] sm:$0xf]  ;;  %vm80_vm0 = vcmask 130048  }
   0xf   :  { %v101_v1 = vld [vmem:[#allocation7 + $0x18] sm:$0xff]  ;;  %91 = vmatpush.bf16.msra.mxu0 %v155_v0  ;;  %v100_v3 = vld [vmem:[#allocation7 + $0x10] sm:$0xff]  ;;  %v99_v4 = vld [vmem:[#allocation7 + $0x8] sm:$0xff]  ;;  %vm106_vm1 = vcmask 261120   ;;  %s275_s13 = smov [#allocation8]   ;;  %s138_s17 = sshll.u32 %s329_s5, 4  ;;  %s139_s17 = int_to_ptr.hbm [resolvable:$true] %s138_s17 }
  0x10   :  { %122 = vmatpush.msra.mxu1 %v101_v1  ;;  %v98_v5 = vld [vmem:[#allocation7] sm:$0xff]  ;;  %v164_v6 = vld [vmem:[%s326_s2] ss:$0 sm:$0xff]  ;;  %s136_s14 = sshll.u32 %s275_s13, 4  ;;  %s137_s14 = int_to_ptr.vmem [resolvable:$true] %s136_s14 }
  0x11   :  { %v165_v11 = vld [vmem:[%s328_s4] ss:$0 sm:$0xff] }
  0x12   :  { %153 = vmatmul.msk.bf16.vlgmr.msra.gmra.mxu0 %vm80_vm0, %v67_v2  ;;  %123 = vmatpush.msra.mxu1 %v100_v3 }
  0x14   :  { %124 = vmatpush.msra.mxu1 %v99_v4 }
  0x16   :  { %125 = vmatpush.msra.mxu1 %v98_v5 }
  0x8f   :  { %v93_v7 = vpop.f32.mrf.mxu0 }
  0x90   :  { %v94_v8 = vadd.f32 %v164_v6, %v93_v7 }
  0x92   :  { %v97_v9 = vmax.f32 %v94_v8, 0.0 }
  0x94   :  { %154 = vmatmul.msk.f32.vlgmr.msra.gmra.mxu1 %vm106_vm1, %v97_v9 }
  0x97   :  { %v95_v10 = vpop.f32.mrf.mxu0 }
 0x111   :  { %v127_v12 = vpop.f32.mrf.mxu1 }
 0x112   :  { %v128_v13 = vadd.f32 %v165_v11, %v127_v12 }
 0x114   :  { %130 = vst [vmem:[#allocation8] sm:$0xff] %v128_v13 }
 0x115   :  { %141 = dma.vmem_to_hbm [thread:$0]  %s137_s14, 128, %s139_s17, [#allocation4]  }
 0x116   :  { %266 = dma.done.wait [#allocation4], 128  }
 0x117   :  { %267 = vsyncadd [#allocation4], 4294967168 }
 0x118   :  { %146 = vsyncpa [#allocation3], 1 }
 0x119   :  { %147 = vsyncpa [#allocation6], 1 }
 0x11a   :  { %148 = vsyncpa [#allocation4], 1 }

</bundles_post_ra>
